<compile_context>
chip_gen: v5e
topology: v5e:2x2
jax: 0.10.0
libtpu: 0.0.40
codegen_flags: <defaults>
</compile_context>

<pallas_src>
import functools

import jax
import jax.numpy as jnp
from jax.experimental import pallas as pl
from jax.experimental.pallas import tpu as pltpu

LN_EPS = 1e-5  # torch.nn.LayerNorm default


def _round_up(x, m):
    return (x + m - 1) // m * m


# ---------------------------------------------------------------------------
# Capability probes / hardware-aware budgets
# ---------------------------------------------------------------------------
def _probe_single_buffer():
    """True if BlockSpec accepts pipeline_mode=pl.Buffered(1)."""
    try:
        pl.BlockSpec((8, 128), lambda i: (0, 0), pipeline_mode=pl.Buffered(1))
        return True
    except Exception:
        return False


_SINGLE_BUFFER_CONSTS = _probe_single_buffer()
_CONST_BUFS = 1 if _SINGLE_BUFFER_CONSTS else 2


def _const_spec(block_shape):
    """BlockSpec for a grid-invariant operand (constant index_map)."""
    idx = lambda i: (0, 0)
    if _SINGLE_BUFFER_CONSTS:
        return pl.BlockSpec(block_shape, idx, pipeline_mode=pl.Buffered(1))
    return pl.BlockSpec(block_shape, idx)


def _vmem_budget():
    """(tile budget, scoped vmem_limit_bytes), generation-aware."""
    cap = 64 * 1024 * 1024  # conservative default: v7x per-TensorCore VMEM
    try:
        info = pltpu.get_tpu_info()
        c = getattr(info, "vmem_capacity_bytes", None)
        if c:
            cap = int(c)
    except Exception:
        pass
    limit = (cap * 3) // 4          # 96 MiB on 128 MiB parts, 48 MiB on v7x
    budget = (limit * 85) // 100    # headroom for compiler-internal scratch
    return budget, limit


def _vmem_bytes(tm, k, n_pad, x_bytes, out_bytes):
    """Estimate of real VMEM use including physical (8,128) layout padding."""
    k_lane = _round_up(k, 128)                 # K < 128 still burns full lanes
    x_tile = 2 * tm * k_lane * x_bytes         # double-buffered input tile
    o_tile = 2 * tm * n_pad * out_bytes        # double-buffered output tile
    y_f32 = tm * n_pad * 4                     # f32 matmul / LN intermediate
    w_blk = _CONST_BUFS * _round_up(k, 8) * n_pad * x_bytes   # resident weight
    p_blk = _CONST_BUFS * 8 * n_pad * 4        # (3, N_pad) sublane-pads to 8
    return x_tile + o_tile + y_f32 + w_blk + p_blk


def _pick_row_tile(m, k, n_pad, budget, x_bytes, out_bytes):
    """Largest row tile (multiple of 8) fitting the VMEM budget.

    Prefers tiles that divide M exactly (no M padding -> no extra HBM pad/slice
    passes) and, among those, an even step count >= 2 so v7x's two TensorCores
    get balanced halves of the parallel grid axis.
    """
    m8 = _round_up(m, 8)
    max_tm = min(1024, m8)
    fitting = [t for t in range(8, max_tm + 1, 8)
               if _vmem_bytes(t, k, n_pad, x_bytes, out_bytes) <= budget]
    if not fitting:
        return 8
    best = max(fitting)
    floor = max(8, best // 4)   # don't accept absurdly small divisor tiles
    divisors = [t for t in fitting if m % t == 0 and t >= floor]
    even_div = [t for t in divisors if (m // t) >= 2 and (m // t) % 2 == 0]
    if even_div:
        return max(even_div)
    if divisors:
        return max(divisors)
    return best


# ---------------------------------------------------------------------------
# Kernel
# ---------------------------------------------------------------------------
def _patch_embed_kernel(x_ref, w_ref, p_ref, o_ref, *, n_real, n_pad):
    # x_ref: (tm, K) patch rows (bf16 or f32); w_ref: (K, N_pad);
    # p_ref: (3, N_pad) f32 = [bias; gamma; beta]; o_ref: (tm, N_pad)
    y = jnp.dot(x_ref[...], w_ref[...], preferred_element_type=jnp.float32)
    p = p_ref[...]
    y = y + p[0:1, :]                       # padded lanes stay exactly 0

    inv_n = 1.0 / n_real
    # Padded lanes of y are exactly zero (zero weight columns + zero bias), so
    # a plain sum over the padded width equals the sum over the real width.
    mean = jnp.sum(y, axis=-1, keepdims=True) * inv_n
    c = y - mean
    if n_pad != n_real:
        # Mask padded lanes out of the centered sum (they would contribute
        # mean^2 each otherwise).  Static Python branch: free when not needed.
        lane = jax.lax.broadcasted_iota(jnp.int32, y.shape, 1)
        c = jnp.where(lane < n_real, c, 0.0)
    var = jnp.sum(c * c, axis=-1, keepdims=True) * inv_n   # two-pass variance
    y_hat = c * jax.lax.rsqrt(var + LN_EPS)
    o_ref[...] = (y_hat * p[1:2, :] + p[2:3, :]).astype(o_ref.dtype)


# ---------------------------------------------------------------------------
# Wrapper
# ---------------------------------------------------------------------------
@functools.partial(jax.jit, static_argnames=("patch_size", "use_bf16"))
def patch_embed(x, w, b, gamma, beta, *, patch_size, use_bf16=True):
    """x: (B, C, H, W) NCHW.  w: (embed_dim, C, ph, pw) conv weight.
    Returns (tokens (B, num_patches, embed_dim), (H_out, W_out))."""
    B, C, H, W = x.shape
    ph, pw = patch_size
    Ho, Wo = H // ph, W // pw
    num_patches = Ho * Wo
    embed_dim = w.shape[0]
    K = C * ph * pw
    M = B * num_patches

    stream_dtype = jnp.bfloat16 if use_bf16 else x.dtype
    out_dtype = x.dtype

    # ---- glue: extract non-overlapping patches, flatten in (c, u, v) order --
    # (B, C, Ho, ph, Wo, pw) -> (B, Ho, Wo, C, ph, pw) -> (M, K).
    # Materialized once by XLA (the bf16 cast fuses into this transpose); the
    # kernel then streams it with contiguous full-bandwidth DMAs.
    xp = x.reshape(B, C, Ho, ph, Wo, pw)
    xp = jnp.transpose(xp, (0, 2, 4, 1, 3, 5))
    xp = xp.reshape(M, K).astype(stream_dtype)

    # Conv weight (E, C, ph, pw) -> (K, E); lane-pad E to a multiple of 128 so
    # output stores are unmasked full-lane vst.  Padded columns are zero, and
    # bias/gamma/beta are merged into one (3, N_pad) operand.
    N_pad = _round_up(embed_dim, 128)
    pad_n = N_pad - embed_dim
    w2d = w.reshape(embed_dim, K).T.astype(stream_dtype)
    params = jnp.stack([b, gamma, beta]).astype(jnp.float32)   # (3, embed_dim)
    if pad_n:
        w2d = jnp.pad(w2d, ((0, 0), (0, pad_n)))
        params = jnp.pad(params, ((0, 0), (0, pad_n)))

    x_bytes = jnp.dtype(stream_dtype).itemsize
    out_bytes = jnp.dtype(out_dtype).itemsize
    budget, vmem_limit = _vmem_budget()
    tm = _pick_row_tile(M, K, N_pad, budget, x_bytes, out_bytes)
    M_pad = _round_up(M, tm)
    if M_pad != M:   # only when no divisor tile fits the VMEM budget
        xp = jnp.pad(xp, ((0, M_pad - M), (0, 0)))

    kernel = functools.partial(_patch_embed_kernel, n_real=embed_dim, n_pad=N_pad)

    cost = pl.CostEstimate(
        flops=2 * M_pad * K * N_pad,
        transcendentals=M_pad,   # one rsqrt per token row
        bytes_accessed=(M_pad * K * x_bytes + K * N_pad * x_bytes
                        + 3 * N_pad * 4 + M_pad * N_pad * out_bytes),
    )

    out = pl.pallas_call(
        kernel,
        out_shape=jax.ShapeDtypeStruct((M_pad, N_pad), out_dtype),
        grid_spec=pltpu.PrefetchScalarGridSpec(
            num_scalar_prefetch=0,
            grid=(M_pad // tm,),
            in_specs=[
                pl.BlockSpec((tm, K), lambda i: (i, 0)),   # streamed patch rows
                _const_spec((K, N_pad)),                    # resident weight
                _const_spec((3, N_pad)),                    # bias/gamma/beta
            ],
            out_specs=pl.BlockSpec((tm, N_pad), lambda i: (i, 0)),
        ),
        compiler_params=pltpu.CompilerParams(
            dimension_semantics=("parallel",),   # row tiles shard across TCs
            vmem_limit_bytes=vmem_limit,
        ),
        cost_estimate=cost,
    )(xp, w2d, params)

    if M_pad != M or pad_n:
        out = out[:M, :embed_dim]
    tokens = out.reshape(B, num_patches, embed_dim)
    return tokens, (Ho, Wo)


# ---------------------------------------------------------------------------
# Pure-JAX reference mirroring the PyTorch forward
# ---------------------------------------------------------------------------
def _reference(x, w, b, gamma, beta, patch_size):
    ph, pw = patch_size
    y = jax.lax.conv_general_dilated(
        x, w, window_strides=(ph, pw), padding="VALID",
        dimension_numbers=("NCHW", "OIHW", "NCHW"),
        precision=jax.lax.Precision.HIGHEST)
    y = y + b.reshape(1, -1, 1, 1)
    B, E, Ho, Wo = y.shape
    y = y.reshape(B, E, Ho * Wo).transpose(0, 2, 1)   # flatten(2).transpose(1,2)
    mean = y.mean(-1, keepdims=True)
    var = ((y - mean) ** 2).mean(-1, keepdims=True)
    y = (y - mean) / jnp.sqrt(var + LN_EPS) * gamma + beta
    return y, (Ho, Wo)


if __name__ == "__main__":
    # Small shapes consistent with PatchEmbed(img_size=16, patch_size=4,
    # in_chans=4, embed_dim=32)
    B, C, H, W = 2, 4, 16, 16
    ph = pw = 4
    embed_dim = 32

    key = jax.random.PRNGKey(0)
    k1, k2, k3, k4, k5 = jax.random.split(key, 5)
    x = jax.random.normal(k1, (B, C, H, W), dtype=jnp.float32)
    w = jax.random.normal(k2, (embed_dim, C, ph, pw), dtype=jnp.float32) * 0.05
    b = jax.random.normal(k3, (embed_dim,), dtype=jnp.float32) * 0.05
    gamma = 1.0 + 0.1 * jax.random.normal(k4, (embed_dim,), dtype=jnp.float32)
    beta = 0.1 * jax.random.normal(k5, (embed_dim,), dtype=jnp.float32)

    ref_tokens, (rHo, rWo) = _reference(x, w, b, gamma, beta, (ph, pw))

    # Default perf path: bf16-streamed inputs, f32 accumulation / LayerNorm.
    tokens, (Ho, Wo) = patch_embed(x, w, b, gamma, beta,
                                   patch_size=(ph, pw), use_bf16=True)
    tokens = jax.block_until_ready(tokens)
    assert tokens.shape == (B, (H // ph) * (W // pw), embed_dim), tokens.shape
    assert (int(Ho), int(Wo)) == (rHo, rWo) == (H // ph, W // pw)
    err_bf16 = float(jnp.max(jnp.abs(tokens - ref_tokens)))
    assert jnp.allclose(tokens, ref_tokens, atol=5e-2, rtol=5e-2), err_bf16

    # Full-f32 path: tighter check of the fused conv-as-matmul + LN math.
    tokens32, _ = patch_embed(x, w, b, gamma, beta,
                              patch_size=(ph, pw), use_bf16=False)
    tokens32 = jax.block_until_ready(tokens32)
    err_f32 = float(jnp.max(jnp.abs(tokens32 - ref_tokens)))
    assert jnp.allclose(tokens32, ref_tokens, atol=2e-2, rtol=2e-2), err_f32

    print("KERNEL_OK")
</pallas_src>

<mosaic_0001>
module attributes {stable_mosaic.version = 11 : i64} {
  func.func @_patch_embed_kernel(%arg0: i32, %arg1: memref<16x64xbf16, #tpu.memory_space<vmem>>, %arg2: memref<64x128xbf16, #tpu.memory_space<vmem>>, %arg3: memref<3x128xf32, #tpu.memory_space<vmem>>, %arg4: memref<16x128xf32, #tpu.memory_space<vmem>>) attributes {dimension_semantics = [#tpu.dimension_semantics<parallel>], iteration_bounds = array<i64: 2>, scalar_prefetch = 0 : i64, scratch_operands = 0 : i64, tpu.core_type = #tpu.core_type<tc>, window_params = [{transform_indices = @transform_0, window_bounds = array<i64: 16, 64>}, {pipeline_mode = #tpu.pipeline_mode<synchronous>, transform_indices = @transform_1, window_bounds = array<i64: 64, 128>}, {pipeline_mode = #tpu.pipeline_mode<synchronous>, transform_indices = @transform_2, window_bounds = array<i64: 3, 128>}, {transform_indices = @transform_3, window_bounds = array<i64: 16, 128>}]} {
    %c0 = arith.constant 0 : index
    %c0_0 = arith.constant 0 : index
    %0 = vector.load %arg1[%c0, %c0_0] : memref<16x64xbf16, #tpu.memory_space<vmem>>, vector<16x64xbf16>
    %c0_1 = arith.constant 0 : index
    %c0_2 = arith.constant 0 : index
    %1 = vector.load %arg2[%c0_1, %c0_2] : memref<64x128xbf16, #tpu.memory_space<vmem>>, vector<64x128xbf16>
    %cst = arith.constant dense<0.000000e+00> : vector<16x128xf32>
    %2 = tpu.matmul %0, %1, %cst {dimension_numbers = #tpu.dot_dimension_numbers<[1], [0], [0], [1], [0, 0, 1, 1], [], []>} : vector<16x64xbf16>, vector<64x128xbf16>, vector<16x128xf32> -> vector<16x128xf32>
    %c0_3 = arith.constant 0 : index
    %c0_4 = arith.constant 0 : index
    %3 = vector.load %arg3[%c0_3, %c0_4] : memref<3x128xf32, #tpu.memory_space<vmem>>, vector<3x128xf32>
    %4 = vector.extract_strided_slice %3 {offsets = [0, 0], sizes = [1, 128], strides = [1, 1]} : vector<3x128xf32> to vector<1x128xf32>
    %5 = vector.broadcast %4 : vector<1x128xf32> to vector<16x128xf32>
    %6 = arith.addf %2, %5 : vector<16x128xf32>
    %cst_5 = arith.constant dense<0.000000e+00> : vector<16xf32>
    %7 = vector.multi_reduction <add>, %6, %cst_5 [1] : vector<16x128xf32> to vector<16xf32>
    %8 = vector.shape_cast %7 : vector<16xf32> to vector<16x1xf32>
    %cst_6 = arith.constant 3.125000e-02 : f32
    %9 = vector.broadcast %cst_6 : f32 to vector<16x1xf32>
    %10 = arith.mulf %8, %9 : vector<16x1xf32>
    %11 = vector.broadcast %10 : vector<16x1xf32> to vector<16x128xf32>
    %12 = arith.subf %6, %11 : vector<16x128xf32>
    %13 = tpu.iota {dimensions = array<i32: 1>} : vector<16x128xi32>
    %c32_i32 = arith.constant 32 : i32
    %14 = vector.broadcast %c32_i32 : i32 to vector<16x128xi32>
    %15 = arith.cmpi slt, %13, %14 : vector<16x128xi32>
    %cst_7 = arith.constant 0.000000e+00 : f32
    %16 = vector.broadcast %cst_7 : f32 to vector<16x128xf32>
    %17 = arith.select %15, %12, %16 : vector<16x128xi1>, vector<16x128xf32>
    %18 = arith.mulf %17, %17 : vector<16x128xf32>
    %cst_8 = arith.constant dense<0.000000e+00> : vector<16xf32>
    %19 = vector.multi_reduction <add>, %18, %cst_8 [1] : vector<16x128xf32> to vector<16xf32>
    %20 = vector.shape_cast %19 : vector<16xf32> to vector<16x1xf32>
    %cst_9 = arith.constant 3.125000e-02 : f32
    %21 = vector.broadcast %cst_9 : f32 to vector<16x1xf32>
    %22 = arith.mulf %20, %21 : vector<16x1xf32>
    %cst_10 = arith.constant 9.99999974E-6 : f32
    %23 = vector.broadcast %cst_10 : f32 to vector<16x1xf32>
    %24 = arith.addf %22, %23 : vector<16x1xf32>
    %25 = math.rsqrt %24 : vector<16x1xf32>
    %26 = vector.broadcast %25 : vector<16x1xf32> to vector<16x128xf32>
    %27 = arith.mulf %17, %26 : vector<16x128xf32>
    %28 = vector.extract_strided_slice %3 {offsets = [1, 0], sizes = [1, 128], strides = [1, 1]} : vector<3x128xf32> to vector<1x128xf32>
    %29 = vector.broadcast %28 : vector<1x128xf32> to vector<16x128xf32>
    %30 = arith.mulf %27, %29 : vector<16x128xf32>
    %31 = vector.extract_strided_slice %3 {offsets = [2, 0], sizes = [1, 128], strides = [1, 1]} : vector<3x128xf32> to vector<1x128xf32>
    %32 = vector.broadcast %31 : vector<1x128xf32> to vector<16x128xf32>
    %33 = arith.addf %30, %32 : vector<16x128xf32>
    %c0_11 = arith.constant 0 : index
    %c0_12 = arith.constant 0 : index
    %34 = vector.load %arg4[%c0_11, %c0_12] : memref<16x128xf32, #tpu.memory_space<vmem>>, vector<16x128xf32>
    tpu.vector_store %arg4[%c0_11, %c0_12], %33 {strides = array<i32>} : memref<16x128xf32, #tpu.memory_space<vmem>>, vector<16x128xf32>,
    return
  }
  func.func @transform_0(%arg0: i32) -> (i32, i32) {
    %c0_i32 = arith.constant 0 : i32
    %c0_i32_0 = arith.constant 0 : i32
    return %arg0, %c0_i32 : i32, i32
  }
  func.func @transform_1(%arg0: i32) -> (i32, i32) {
    %c0_i32 = arith.constant 0 : i32
    %c0_i32_0 = arith.constant 0 : i32
    %c0_i32_1 = arith.constant 0 : i32
    return %c0_i32, %c0_i32_0 : i32, i32
  }
  func.func @transform_2(%arg0: i32) -> (i32, i32) {
    %c0_i32 = arith.constant 0 : i32
    %c0_i32_0 = arith.constant 0 : i32
    %c0_i32_1 = arith.constant 0 : i32
    return %c0_i32, %c0_i32_0 : i32, i32
  }
  func.func @transform_3(%arg0: i32) -> (i32, i32) {
    %c0_i32 = arith.constant 0 : i32
    %c0_i32_0 = arith.constant 0 : i32
    return %arg0, %c0_i32 : i32, i32
  }
}

</mosaic_0001>

<bundles_post_ra>
// kernel: patch_embed.1
= control target key start
LH: loop header
LB: loop body
LE: loop exit
PB: predicated region body
PF: predicated region fallthrough
CT: control target
= control target key end

     0   :  { %8 = vsyncpa [#allocation3], 0  ;;  %s637_s0 = inlined_call_operand.vmem [shape: bf16[32,64], index: 0, kind: input, shape index: {}]   ;;  %s638_s1 = inlined_call_operand.vmem [shape: bf16[64,128], index: 1, kind: input, shape index: {}]   ;;  %s639_s2 = inlined_call_operand.vmem [shape: f32[3,128], index: 2, kind: input, shape index: {}]   ;;  %s640_s3 = inlined_call_operand.hbm [shape: f32[32,128], index: 3, kind: output, shape index: {}]  }
   0x1   :  { %10 = vsyncpa [#allocation3 + $0x1], 0  ;;  %s533_s12 = smov 0   ;;  %s535_s13 = smov 0  }
   0x2   :  { %s537_s14 = smov 0   ;;  %s539_s15 = smov 0  }
   0x3 LB: > { %s554_s16 = sadd.s32 4294967295, %s509_s15   ;;  %s363_s17 = sadd.s32 4294967294, %s509_s15   ;;  %s509_s15 = sphi %s539_s15, %s646_s15   ;;  %s505_s14 = sphi %s537_s14, %s645_s14   ;;  %s501_s13 = sphi %s535_s13, %s644_s13   ;;  %s497_s12 = sphi %s533_s12, %s643_s12  }
   0x4   : > { %s558_s18 = sadd.s32 1, %s509_s15   ;;  %s91_s19 = sadd.s32 1, %s505_s14 }
   0x5   : > { %s88_s20 = ssub.s32 %s509_s15, %s558_s18  ;;  %p101_p0 = scmp.ne.s32.totalorder %s505_s14, %s501_s13 }
   0x6   : > { %p89_p1 = scmp.eq.s32.totalorder %s88_s20, 0  ;;  %p102_p2 = scmp.eq.s32.totalorder %s554_s16, 1 }
   0x7   : > { %p107_p3 = scmp.ne.s32.totalorder %s501_s13, %s497_s12  ;;  %p108_p4 = scmp.eq.s32.totalorder %s363_s17, 1 }
   0x8   : > { %s569_s21 = scalar_select %p89_p1, %s505_s14, %s91_s19  }
   0x9   : > { %p571_p5 = por %p102_p2, %p101_p0  ;;  %p575_p6 = por %p108_p4, %p107_p3 }
   0xa   : > { %p366_p7 = scmp.ge.s32.totalorder %s509_s15, 1  ;;  %p141_p8 = scmp.lt.s32.totalorder %s509_s15, 3 }
   0xc   : > { %p142_p9 = pnand %p366_p7, %p141_p8 }
   0xd   : > { %s368_s26 = sshll.u32 (!%p142_p9), %s554_s16, 1  ;;  %s162_s17 = sand.u32 (!%p142_p9), 1, %s501_s13  }
   0xe   : > { %145 = sbr.rel (%p142_p9) target bundleno = 442 (0x1ba), region = 32  ;;  %p166_p10 = scmp.lt.s32.totalorder (!%p142_p9), %s368_s26, 3 }
   0xf   : > { %s367_s19 = sshll.u32 (!%p142_p9), %s162_s17, 4  ;;  %s401_s20 = sshll.u32 (!%p142_p9), %s554_s16, 4 }
  0x10   : > { %s164_s27 = scalar_lea.vmem (!%p142_p9), [#allocation2], %s367_s19  ;;  %s286_s16 = scalar_lea.sflag (!%p142_p9), [#allocation3], %s162_s17 }
  0x11   : > { %s298_s28 = sshll.u32 (!%p142_p9), %s164_s27, 4  ;;  %s467_s7 = scalar_lea.hbm (!%p142_p9), %s640_s3, 32  ;;  %s299_s28 = int_to_ptr.vmem [resolvable:$true] %s298_s28 }
  0x13   : > { %v400_v0 = vld [vmem:[%s638_s1 + $0x18] sm:$0xff]  ;;  %v399_v1 = vld [vmem:[%s638_s1 + $0x10] sm:$0xff]  ;;  %s648_s26 = smov (!%p166_p10, %s368_s26), 3  ;;  %v398_v2 = vld [vmem:[%s638_s1 + $0x8] sm:$0xff]  ;;  %vm214_vm0 = vcmask 523264   ;;  %v240_v11 = vlaneseq }
  0x14   : > { %222 = vmatpush.bf16.msra.mxu0 %v400_v0  ;;  %s369_s4 = sshll.u32 %s648_s26, 2  ;;  %v397_v3 = vld [vmem:[%s638_s1] sm:$0xff]  ;;  %s297_s26 = scalar_lea.hbm %s640_s3, %s401_s20 }
  0x15   : > { %s169_s9 = scalar_lea.vmem %s637_s0, %s369_s4  ;;  %v600_v5 = vld [vmem:[%s639_s2] sm:$0x7]  ;;  %v241_v12 = vand.u32 127, %v240_v11  ;;  %s300_s29 = sshll.u32 %s297_s26, 4  ;;  %s301_s29 = int_to_ptr.hbm [resolvable:$true] %s300_s29 }
  0x16   : > { %v396_v4 = vld [vmem:[%s169_s9] sm:$0xff]  ;;  %v184_v6 = vperm.slane %v600_v5, 0  ;;  %v277_v37 = vperm.slane %v600_v5, 1  ;;  %v280_v40 = vperm.slane %v600_v5, 2  ;;  %s461_s30 = sshra.s32 %s301_s29, 4  ;;  %s462_s30 = int_to_ptr.hbm [resolvable:$true] %s461_s30 }
  0x17   : > { %vm242_vm1 = vcmp.lt.s32.totalorder %v241_v12, 32  ;;  %s463_s4 = scalar_lea.hbm %s462_s30, 16  ;;  %p468_p0 = scmp.lt.s32.totalorder %s462_s30, %s640_s3 }
  0x18   : > { %223 = vmatpush.bf16.msra.mxu0 %v399_v1  ;;  %p464_p11 = scmp.ne.s32.totalorder %s462_s30, %s463_s4  ;;  %p469_p1 = scmp.lt.s32.totalorder %s467_s7, %s463_s4 }
  0x1a   : > { %p465_p12 = pnand %p464_p11, %p571_p5  ;;  %p470_p2 = por %p469_p1, %p468_p0 }
  0x1c   : > { %224 = vmatpush.bf16.msra.mxu0 %v398_v2  ;;  %p466_p13 = pneg %p465_p12 }
  0x1e   : > { %p471_p3 = pnand %p470_p2, %p466_p13 }
  0x20   : > { %225 = vmatpush.bf16.msra.mxu0 %v397_v3 }
  0x23   : > { %390 = vmatmul.msk.bf16.vlgmr.msra.gmra.mxu0 %vm214_vm0, %v396_v4 }
  0xa0   : > { %v227_v7 = vpop.f32.mrf.mxu0 }
  0xa1   : > { %v228_v8 = vadd.f32 %v227_v7, %v184_v6 }
  0xa3   : > { %232 = vadd.xlane.f32.xlu0 %v228_v8 }
  0xa8   : > { %v229_v9 = vpop.f32.mrf.mxu0 }
  0xa9   : > { %v230_v10 = vadd.f32 %v229_v9, %v184_v6 }
  0xab   : > { %234 = vadd.xlane.f32.xlu0 %v230_v10 }
 0x116   : > { %v233_v13 = vpop.xlane.xlu0 %232 }
 0x117   : > { %v236_v14 = vmul.f32 0.03125, %v233_v13 }
 0x119   : > { %v238_v15 = vsub.f32 %v228_v8, %v236_v14 }
 0x11b   : > { %v243_v16 = vsel %vm242_vm1, %v238_v15, 0.0 }
 0x11c   : > { %v245_v17 = vmul.f32 %v243_v16, %v243_v16 }
 0x11e   : > { %247 = vadd.xlane.f32.xlu1 %v245_v17  ;;  %v235_v18 = vpop.xlane.xlu0 %234 }
 0x11f   : > { %v237_v19 = vmul.f32 0.03125, %v235_v18 }
 0x121   : > { %v239_v20 = vsub.f32 %v230_v10, %v237_v19 }
 0x123   : > { %v244_v21 = vsel %vm242_vm1, %v239_v20, 0.0 }
 0x124   : > { %v246_v22 = vmul.f32 %v244_v21, %v244_v21 }
 0x126   : > { %249 = vadd.xlane.f32.xlu1 %v246_v22 }
 0x191   : > { %v248_v23 = vpop.xlane.xlu1 %247 }
 0x192   : > { %v251_v24 = vmul.f32 0.03125, %v248_v23 }
 0x194   : > { %v253_v25 = vadd.f32 1e-05, %v251_v24 }
 0x196   : > { %443 = vrsqrt.f32 %v253_v25  ;;  %vm261_vm3 = vweird.f32 %v253_v25 }
 0x199   : > { %v250_v26 = vpop.xlane.xlu1 %249 }
 0x19a   : > { %v252_v27 = vmul.f32 0.03125, %v250_v26 }
 0x19c   : > { %v444_v28 = vpop.eup %443  ;;  %v254_v29 = vadd.f32 1e-05, %v252_v27 }
 0x19d   : > { %v256_v30 = vmul.f32 %v444_v28, %v253_v25  ;;  %vm262_vm2 = vweird.f32 %v444_v28 }
 0x19e   : > { %445 = vrsqrt.f32 %v254_v29  ;;  %vm263_vm4 = vmor %vm261_vm3, %vm262_vm2  ;;  %vm271_vm6 = vweird.f32 %v254_v29 }
 0x19f   : > { %v257_v31 = vmul.f32 %v444_v28, %v256_v30 }
 0x1a1   : > { %v258_v32 = vmul.f32 0.5, %v257_v31 }
 0x1a3   : > { %v259_v33 = vsub.f32 1.5, %v258_v32 }
 0x1a4   : > { %v446_v34 = vpop.eup %445 }
 0x1a5   : > { %v260_v35 = vmul.f32 %v444_v28, %v259_v33  ;;  %v266_v36 = vmul.f32 %v446_v34, %v254_v29  ;;  %vm272_vm5 = vweird.f32 %v446_v34 }
 0x1a6   : > { %vm273_vm7 = vmor %vm271_vm6, %vm272_vm5 }
 0x1a7   : > { %v264_v38 = vsel %vm263_vm4, %v444_v28, %v260_v35  ;;  %v267_v39 = vmul.f32 %v446_v34, %v266_v36 }
 0x1a8   : > { %v275_v41 = vmul.f32 %v264_v38, %v243_v16 }
 0x1a9   : > { %v268_v42 = vmul.f32 0.5, %v267_v39 }
 0x1aa   : > { %v278_v43 = vmul.f32 %v277_v37, %v275_v41 }
 0x1ab   : > { %v269_v44 = vsub.f32 1.5, %v268_v42 }
 0x1ac   : > { %v281_v45 = vadd.f32 %v280_v40, %v278_v43 }
 0x1ad   : > { %v270_v46 = vmul.f32 %v446_v34, %v269_v44 }
 0x1ae   : > { %283 = vst [vmem:[%s164_s27] sm:$0xff] %v281_v45 }
 0x1af   : > { %v274_v47 = vsel %vm273_vm7, %v446_v34, %v270_v46 }
 0x1b0   : > { %v276_v48 = vmul.f32 %v274_v47, %v244_v21 }
 0x1b2   : > { %v279_v49 = vmul.f32 %v277_v37, %v276_v48 }
 0x1b4   : > { %v282_v50 = vadd.f32 %v280_v40, %v279_v49 }
 0x1b6   : > { %284 = vst [vmem:[%s164_s27 + $0x8] sm:$0xff] %v282_v50 }
 0x1b7   : > { %474 = shalt.err (!%p471_p3)
}
 0x1b8   : > { %s511_s10 = smov 128   ;;  %s512_s11 = smov 8  }
 0x1b9   : > { %402 = dma.vmem_to_hbm [thread:$0]  (%p571_p5), %s299_s28, 256, %s301_s29, %s286_s16, %s511_s10, %s511_s10, %s512_s11  }
 0x1ba PF: > { %p408_p4 = scmp.ge.s32.totalorder %s509_s15, 2  ;;  %s315_s17 = sand.u32 1, %s497_s12  }
 0x1bb   : > { %s316_s19 = scalar_lea.sflag [#allocation3], %s315_s17 }
 0x1bc   : > { %p405_p7 = pnand %p408_p4, %p575_p6 }
 0x1be   : > { %p406_p8 = pneg %p405_p7 }
 0x1c0   : > { %492 = dma.done.wait (%p406_p8), %s316_s19, 256  }
 0x1c1   : > { %494 = vsyncadd (%p406_p8), %s316_s19, 4294967040  ;;  %p13_p9 = scmp.ge.s32.totalorder %s558_s18, 4   ;;  %s643_s12 = smov %s501_s13 }
 0x1c2   : > { %s644_s13 = smov %s505_s14  ;;  %s645_s14 = smov %s569_s21 }
 0x1c3   : > { %s646_s15 = smov %s558_s18  ;;  %15 = sbr.rel (!%p13_p9) target bundleno = 3 (0x3), region = 67 }
 0x1c8   :  { %322 = vsyncpa [#allocation3], 1 }
 0x1c9   :  { %324 = vsyncpa [#allocation3 + $0x1], 1 }

</bundles_post_ra>
